<compile_context>
chip_gen: v7x
topology: tpu7x:2x2x1
jax: 0.10.0
libtpu: 0.0.40
codegen_flags: <defaults>
</compile_context>

<pallas_src>
import math

import jax
import jax.numpy as jnp
from jax.experimental import pallas as pl
from jax.experimental.pallas import tpu as pltpu


def _round_up(x, m):
    return ((x + m - 1) // m) * m


def _gelu_new(x):
    # HF "gelu_new": 0.5*x*(1+tanh(sqrt(2/pi)*(x+0.044715*x^3))), in f32.
    c = math.sqrt(2.0 / math.pi)
    return 0.5 * x * (1.0 + jnp.tanh(c * (x + 0.044715 * x * x * x)))


def mlp_kernel(x_ref, w_in_ref, b_in_ref, w_out_ref, b_out_ref, o_ref, acc_ref):
    # Grid: (row tiles i, H tiles k).  Axis 1 (k) is the reduction over the
    # intermediate dimension of the second matmul.
    # x_ref:     (tm, D)  bf16        w_in_ref:  (D, th)  bf16
    # b_in_ref:  (1, th)  f32         w_out_ref: (th, D)  bf16
    # b_out_ref: (1, D)   f32         o_ref:     (tm, D)  out dtype
    # acc_ref:   (tm, D)  f32 scratch accumulator
    k = pl.program_id(1)

    @pl.when(k == 0)
    def _init():
        acc_ref[...] = jnp.zeros_like(acc_ref)

    # First matmul: bf16 operands on the MXU, f32 accumulate.
    h = jnp.dot(x_ref[...], w_in_ref[...], preferred_element_type=jnp.float32)
    # Bias + gelu in f32 on the (tm, th) slab of the intermediate.
    h = _gelu_new(h + b_in_ref[...])

    # Second matmul: accumulate this H-block's contribution in f32.
    acc_ref[...] += jnp.dot(h.astype(w_out_ref.dtype), w_out_ref[...],
                            preferred_element_type=jnp.float32)

    @pl.when(k == pl.num_programs(1) - 1)
    def _finalize():
        # TODO(synk): dropout omitted (identity in eval mode / inference).
        o_ref[...] = (acc_ref[...] + b_out_ref[...]).astype(o_ref.dtype)


def progen_mlp(x, w_in, b_in, w_out, b_out, *, tm=256, th=1024,
               compute_dtype=jnp.bfloat16):
    """x: [B, T, D]; w_in: [D, H]; b_in: [H]; w_out: [H, D]; b_out: [D]."""
    B, T, D = x.shape
    d_in, H = w_in.shape
    assert d_in == D and w_out.shape == (H, D)
    out_dtype = x.dtype
    M = B * T

    # Row tiling: clamp the tile to the (16-aligned) row count, then pad rows.
    tm = _round_up(max(tm, 16), 16)
    tm = min(tm, _round_up(M, 16))
    M_pad = _round_up(M, tm)

    # H tiling (reduction axis of the second matmul); pad H if needed.
    th = min(th, H)
    H_pad = _round_up(H, th)

    x2 = x.reshape(M, D).astype(compute_dtype)
    if M_pad != M:
        x2 = jnp.pad(x2, ((0, M_pad - M), (0, 0)))

    w_in_c = w_in.astype(compute_dtype)
    w_out_c = w_out.astype(compute_dtype)
    b_in_c = b_in.astype(jnp.float32)
    if H_pad != H:
        # Zero-padded intermediate columns contribute gelu(0)=0 * 0 = 0.
        w_in_c = jnp.pad(w_in_c, ((0, 0), (0, H_pad - H)))
        w_out_c = jnp.pad(w_out_c, ((0, H_pad - H), (0, 0)))
        b_in_c = jnp.pad(b_in_c, (0, H_pad - H))
    b_in2 = b_in_c.reshape(1, H_pad)
    b_out2 = b_out.astype(jnp.float32).reshape(1, D)

    grid = (M_pad // tm, H_pad // th)

    # VMEM budget: double-buffered streamed blocks + accumulator + f32
    # intermediate slab, with ~50% headroom (clamped to [32 MiB, 128 MiB]).
    cbytes = jnp.dtype(compute_dtype).itemsize
    obytes = jnp.dtype(out_dtype).itemsize
    vmem_bytes = (
        2 * tm * D * cbytes        # x tile (double-buffered)
        + 2 * D * th * cbytes      # W_in column block
        + 2 * th * D * cbytes      # W_out row block
        + 2 * (th + D) * 4         # biases (f32)
        + 2 * tm * D * obytes      # output tile
        + tm * D * 4               # f32 accumulator scratch
        + tm * th * 4              # f32 intermediate h slab
    )
    vmem_limit = int(min(max(int(vmem_bytes * 1.5) + (4 << 20), 32 << 20),
                         128 << 20))

    cost = pl.CostEstimate(
        flops=4 * M * D * H,               # two matmuls: 2*M*D*H each
        transcendentals=M * H,             # tanh in gelu_new
        bytes_accessed=int(M * D * cbytes          # x
                           + 2 * D * H * cbytes    # W_in + W_out
                           + (H + D) * 4           # biases
                           + M * D * obytes),      # output
    )

    out2 = pl.pallas_call(
        mlp_kernel,
        out_shape=jax.ShapeDtypeStruct((M_pad, D), out_dtype),
        grid_spec=pltpu.PrefetchScalarGridSpec(
            num_scalar_prefetch=0,
            grid=grid,
            in_specs=[
                pl.BlockSpec((tm, D), lambda i, k: (i, 0)),   # x (const over k)
                pl.BlockSpec((D, th), lambda i, k: (0, k)),   # W_in col block
                pl.BlockSpec((1, th), lambda i, k: (0, k)),   # b_in block
                pl.BlockSpec((th, D), lambda i, k: (k, 0)),   # W_out row block
                pl.BlockSpec((1, D), lambda i, k: (0, 0)),    # b_out (const)
            ],
            out_specs=pl.BlockSpec((tm, D), lambda i, k: (i, 0)),
            scratch_shapes=[pltpu.VMEM((tm, D), jnp.float32)],
        ),
        compiler_params=pltpu.CompilerParams(
            dimension_semantics=("parallel", "arbitrary"),
            vmem_limit_bytes=vmem_limit,
        ),
        cost_estimate=cost,
    )(x2, w_in_c, b_in2, w_out_c, b_out2)

    return out2[:M].reshape(B, T, D)


def _reference(x, w_in, b_in, w_out, b_out):
    # Matches the kernel's precision: bf16 matmul operands, f32 accumulation,
    # bias/gelu in f32.
    xb = x.astype(jnp.bfloat16)
    h = jnp.einsum("btd,dh->bth", xb, w_in.astype(jnp.bfloat16),
                   preferred_element_type=jnp.float32)
    h = _gelu_new(h + b_in.astype(jnp.float32))
    o = jnp.einsum("bth,hd->btd", h.astype(jnp.bfloat16),
                   w_out.astype(jnp.bfloat16),
                   preferred_element_type=jnp.float32)
    return (o + b_out.astype(jnp.float32)).astype(x.dtype)


if __name__ == "__main__":
    # Small shapes consistent with the module: n_embd=128, intermediate=4*n_embd.
    B, T = 2, 8
    n_embd = 128
    intermediate_size = 4 * n_embd  # 512

    key = jax.random.PRNGKey(0)
    k_x, k_wi, k_bi, k_wo, k_bo = jax.random.split(key, 5)

    x = jax.random.normal(k_x, (B, T, n_embd), dtype=jnp.float32)
    # Deterministic synthetic params (torch Linear default-ish scale).
    w_in = jax.random.normal(k_wi, (n_embd, intermediate_size), jnp.float32) * (
        1.0 / math.sqrt(n_embd)
    )
    b_in = jax.random.normal(k_bi, (intermediate_size,), jnp.float32) * 0.01
    w_out = jax.random.normal(k_wo, (intermediate_size, n_embd), jnp.float32) * (
        1.0 / math.sqrt(intermediate_size)
    )
    b_out = jax.random.normal(k_bo, (n_embd,), jnp.float32) * 0.01

    out = progen_mlp(x, w_in, b_in, w_out, b_out)
    out = jax.block_until_ready(out)

    ref = _reference(x, w_in, b_in, w_out, b_out)
    assert out.shape == (B, T, n_embd)
    max_err = float(jnp.max(jnp.abs(out - ref)))
    assert jnp.allclose(out, ref, atol=2e-2, rtol=2e-2), f"mismatch: {max_err}"

    print("KERNEL_OK")
</pallas_src>

<mosaic_0001>
module attributes {stable_mosaic.version = 11 : i64} {
  func.func @mlp_kernel(%arg0: i32, %arg1: i32, %arg2: memref<16x128xbf16, #tpu.memory_space<vmem>>, %arg3: memref<128x512xbf16, #tpu.memory_space<vmem>>, %arg4: memref<1x512xf32, #tpu.memory_space<vmem>>, %arg5: memref<512x128xbf16, #tpu.memory_space<vmem>>, %arg6: memref<1x128xf32, #tpu.memory_space<vmem>>, %arg7: memref<16x128xf32, #tpu.memory_space<vmem>>, %arg8: memref<16x128xf32, #tpu.memory_space<vmem>>) attributes {dimension_semantics = [#tpu.dimension_semantics<parallel>, #tpu.dimension_semantics<arbitrary>], iteration_bounds = array<i64: 1, 1>, scalar_prefetch = 0 : i64, scratch_operands = 1 : i64, tpu.core_type = #tpu.core_type<tc>, window_params = [{transform_indices = @transform_0, window_bounds = array<i64: 16, 128>}, {transform_indices = @transform_1, window_bounds = array<i64: 128, 512>}, {transform_indices = @transform_2, window_bounds = array<i64: 1, 512>}, {transform_indices = @transform_3, window_bounds = array<i64: 512, 128>}, {pipeline_mode = #tpu.pipeline_mode<synchronous>, transform_indices = @transform_4, window_bounds = array<i64: 1, 128>}, {transform_indices = @transform_5, window_bounds = array<i64: 16, 128>}]} {
    %c0_i32 = arith.constant 0 : i32
    %0 = arith.cmpi eq, %arg1, %c0_i32 : i32
    %1 = arith.extui %0 : i1 to i32
    %c0_i32_0 = arith.constant 0 : i32
    %2 = arith.cmpi ne, %1, %c0_i32_0 : i32
    scf.if %2 {
      %cst_19 = arith.constant 0.000000e+00 : f32
      %31 = vector.broadcast %cst_19 : f32 to vector<16x128xf32>
      %c0_20 = arith.constant 0 : index
      %c0_21 = arith.constant 0 : index
      %32 = vector.load %arg8[%c0_20, %c0_21] : memref<16x128xf32, #tpu.memory_space<vmem>>, vector<16x128xf32>
      tpu.vector_store %arg8[%c0_20, %c0_21], %31 {strides = array<i32>} : memref<16x128xf32, #tpu.memory_space<vmem>>, vector<16x128xf32>,
    } else {
    }
    %c0 = arith.constant 0 : index
    %c0_1 = arith.constant 0 : index
    %3 = vector.load %arg2[%c0, %c0_1] : memref<16x128xbf16, #tpu.memory_space<vmem>>, vector<16x128xbf16>
    %c0_2 = arith.constant 0 : index
    %c0_3 = arith.constant 0 : index
    %4 = vector.load %arg3[%c0_2, %c0_3] : memref<128x512xbf16, #tpu.memory_space<vmem>>, vector<128x512xbf16>
    %cst = arith.constant dense<0.000000e+00> : vector<16x512xf32>
    %5 = tpu.matmul %3, %4, %cst {dimension_numbers = #tpu.dot_dimension_numbers<[1], [0], [0], [1], [0, 0, 1, 1], [], []>} : vector<16x128xbf16>, vector<128x512xbf16>, vector<16x512xf32> -> vector<16x512xf32>
    %c0_4 = arith.constant 0 : index
    %c0_5 = arith.constant 0 : index
    %6 = vector.load %arg4[%c0_4, %c0_5] : memref<1x512xf32, #tpu.memory_space<vmem>>, vector<1x512xf32>
    %7 = vector.broadcast %6 : vector<1x512xf32> to vector<16x512xf32>
    %8 = arith.addf %5, %7 : vector<16x512xf32>
    %cst_6 = arith.constant 5.000000e-01 : f32
    %9 = vector.broadcast %cst_6 : f32 to vector<16x512xf32>
    %10 = arith.mulf %9, %8 : vector<16x512xf32>
    %cst_7 = arith.constant 4.471500e-02 : f32
    %11 = vector.broadcast %cst_7 : f32 to vector<16x512xf32>
    %12 = arith.mulf %11, %8 : vector<16x512xf32>
    %13 = arith.mulf %12, %8 : vector<16x512xf32>
    %14 = arith.mulf %13, %8 : vector<16x512xf32>
    %15 = arith.addf %8, %14 : vector<16x512xf32>
    %cst_8 = arith.constant 0.797884583 : f32
    %16 = vector.broadcast %cst_8 : f32 to vector<16x512xf32>
    %17 = arith.mulf %16, %15 : vector<16x512xf32>
    %18 = math.tanh %17 : vector<16x512xf32>
    %cst_9 = arith.constant 1.000000e+00 : f32
    %19 = vector.broadcast %cst_9 : f32 to vector<16x512xf32>
    %20 = arith.addf %19, %18 : vector<16x512xf32>
    %21 = arith.mulf %10, %20 : vector<16x512xf32>
    %c0_10 = arith.constant 0 : index
    %c0_11 = arith.constant 0 : index
    %22 = vector.load %arg8[%c0_10, %c0_11] : memref<16x128xf32, #tpu.memory_space<vmem>>, vector<16x128xf32>
    %23 = arith.truncf %21 : vector<16x512xf32> to vector<16x512xbf16>
    %c0_12 = arith.constant 0 : index
    %c0_13 = arith.constant 0 : index
    %24 = vector.load %arg5[%c0_12, %c0_13] : memref<512x128xbf16, #tpu.memory_space<vmem>>, vector<512x128xbf16>
    %cst_14 = arith.constant dense<0.000000e+00> : vector<16x128xf32>
    %25 = tpu.matmul %23, %24, %cst_14 {dimension_numbers = #tpu.dot_dimension_numbers<[1], [0], [0], [1], [0, 0, 1, 1], [], []>} : vector<16x512xbf16>, vector<512x128xbf16>, vector<16x128xf32> -> vector<16x128xf32>
    %26 = arith.addf %22, %25 : vector<16x128xf32>
    %c0_15 = arith.constant 0 : index
    %c0_16 = arith.constant 0 : index
    %27 = vector.load %arg8[%c0_15, %c0_16] : memref<16x128xf32, #tpu.memory_space<vmem>>, vector<16x128xf32>
    tpu.vector_store %arg8[%c0_15, %c0_16], %26 {strides = array<i32>} : memref<16x128xf32, #tpu.memory_space<vmem>>, vector<16x128xf32>,
    %c0_i32_17 = arith.constant 0 : i32
    %28 = arith.cmpi eq, %arg1, %c0_i32_17 : i32
    %29 = arith.extui %28 : i1 to i32
    %c0_i32_18 = arith.constant 0 : i32
    %30 = arith.cmpi ne, %29, %c0_i32_18 : i32
    scf.if %30 {
      %c0_19 = arith.constant 0 : index
      %c0_20 = arith.constant 0 : index
      %31 = vector.load %arg8[%c0_19, %c0_20] : memref<16x128xf32, #tpu.memory_space<vmem>>, vector<16x128xf32>
      %c0_21 = arith.constant 0 : index
      %c0_22 = arith.constant 0 : index
      %32 = vector.load %arg6[%c0_21, %c0_22] : memref<1x128xf32, #tpu.memory_space<vmem>>, vector<1x128xf32>
      %33 = vector.broadcast %32 : vector<1x128xf32> to vector<16x128xf32>
      %34 = arith.addf %31, %33 : vector<16x128xf32>
      %c0_23 = arith.constant 0 : index
      %c0_24 = arith.constant 0 : index
      %35 = vector.load %arg7[%c0_23, %c0_24] : memref<16x128xf32, #tpu.memory_space<vmem>>, vector<16x128xf32>
      tpu.vector_store %arg7[%c0_23, %c0_24], %34 {strides = array<i32>} : memref<16x128xf32, #tpu.memory_space<vmem>>, vector<16x128xf32>,
    } else {
    }
    return
  }
  func.func @transform_0(%arg0: i32, %arg1: i32) -> (i32, i32) {
    %c0_i32 = arith.constant 0 : i32
    %c0_i32_0 = arith.constant 0 : i32
    return %arg0, %c0_i32 : i32, i32
  }
  func.func @transform_1(%arg0: i32, %arg1: i32) -> (i32, i32) {
    %c0_i32 = arith.constant 0 : i32
    %c0_i32_0 = arith.constant 0 : i32
    return %c0_i32, %arg1 : i32, i32
  }
  func.func @transform_2(%arg0: i32, %arg1: i32) -> (i32, i32) {
    %c0_i32 = arith.constant 0 : i32
    %c0_i32_0 = arith.constant 0 : i32
    return %c0_i32, %arg1 : i32, i32
  }
  func.func @transform_3(%arg0: i32, %arg1: i32) -> (i32, i32) {
    %c0_i32 = arith.constant 0 : i32
    %c0_i32_0 = arith.constant 0 : i32
    return %arg1, %c0_i32 : i32, i32
  }
  func.func @transform_4(%arg0: i32, %arg1: i32) -> (i32, i32) {
    %c0_i32 = arith.constant 0 : i32
    %c0_i32_0 = arith.constant 0 : i32
    %c0_i32_1 = arith.constant 0 : i32
    return %c0_i32, %c0_i32_0 : i32, i32
  }
  func.func @transform_5(%arg0: i32, %arg1: i32) -> (i32, i32) {
    %c0_i32 = arith.constant 0 : i32
    %c0_i32_0 = arith.constant 0 : i32
    return %arg0, %c0_i32 : i32, i32
  }
}

</mosaic_0001>

<bundles_post_ra>
// kernel: tpu_custom_call.1
= control target key start
LH: loop header
LB: loop body
LE: loop exit
PB: predicated region body
PF: predicated region fallthrough
CT: control target
= control target key end

     0   :  { %10 = vsyncpa [#allocation4], 0  ;;  %s1280_s0 = inlined_call_operand.hbm [shape: bf16[16,128], index: 0, kind: input, shape index: {}]   ;;  %s1281_s1 = inlined_call_operand.hbm [shape: bf16[128,512], index: 1, kind: input, shape index: {}]   ;;  %s1282_s2 = inlined_call_operand.vmem [shape: f32[1,512], index: 2, kind: input, shape index: {}]   ;;  %s1283_s3 = inlined_call_operand.hbm [shape: bf16[512,128], index: 3, kind: input, shape index: {}]   ;;  %s1284_s4 = inlined_call_operand.vmem [shape: f32[1,128], index: 4, kind: input, shape index: {}]   ;;  %s1285_s5 = inlined_call_operand.hbm [shape: f32[16,128], index: 5, kind: output, shape index: {}]  }
   0x1   :  { %11 = vsyncpa [#allocation7], 0 }
   0x2   :  { %12 = vsyncpa [#allocation5], 0  ;;  %s1143_s18 = smov [#allocation6]   ;;  %s1049_s22 = scalar_lea.hbm %s1281_s1, 4096 }
   0x3   :  { %s30_s19 = sshll.u32 %s1143_s18, 4  ;;  %p1050_p0 = scmp.ne.s32.totalorder %s1281_s1, %s1049_s22  ;;  %s31_s19 = int_to_ptr.vmem [resolvable:$true] %s30_s19 }
   0x4   :  { %p1053_p1 = scmp.lt.u32.totalorder %s1049_s22, %s1281_s1 }
   0x6   :  { %p1055_p2 = pnand %p1053_p1, %p1050_p0 }
   0x8   :  { %1058 = shalt.err (!%p1055_p2)
}
   0x9   :  { %s1059_s27 = scalar_lea.vmem %s31_s19, 4096  ;;  %p1064_p4 = scmp.lt.s32.totalorder %s31_s19, %s31_s19 }
   0xa   :  { %p1060_p3 = scmp.ne.s32.totalorder %s31_s19, %s1059_s27  ;;  %p1065_p5 = scmp.lt.s32.totalorder %s1059_s27, %s1059_s27 }
   0xc   :  { %p1066_p6 = por %p1065_p5, %p1064_p4 }
   0xe   :  { %p1067_p7 = pnand %p1066_p6, %p1060_p3 }
  0x10   :  { %1070 = shalt.err (!%p1067_p7)
}
  0x11   :  { %s1144_s28 = smov 256   ;;  %s1145_s29 = smov 16  }
  0x12   :  { %36 = dma.hbm_to_vmem [thread:$0]  %s1281_s1, 4096, %s31_s19, [#allocation7], %s1144_s28, %s1144_s28, %s1145_s29  }
  0x13   :  { %s1146_s7 = smov [#allocation3]   ;;  %s1071_s11 = scalar_lea.hbm %s1280_s0, 128 }
  0x14   :  { %s18_s8 = sshll.u32 %s1146_s7, 4  ;;  %p1072_p8 = scmp.ne.s32.totalorder %s1280_s0, %s1071_s11  ;;  %s19_s8 = int_to_ptr.vmem [resolvable:$true] %s18_s8 }
  0x15   :  { %p1075_p9 = scmp.lt.u32.totalorder %s1071_s11, %s1280_s0 }
  0x17   :  { %p1077_p10 = pnand %p1075_p9, %p1072_p8 }
  0x19   :  { %1080 = shalt.err (!%p1077_p10)
}
  0x1a   :  { %s1081_s16 = scalar_lea.vmem %s19_s8, 128  ;;  %p1086_p12 = scmp.lt.s32.totalorder %s19_s8, %s19_s8 }
  0x1b   :  { %p1082_p11 = scmp.ne.s32.totalorder %s19_s8, %s1081_s16  ;;  %p1087_p13 = scmp.lt.s32.totalorder %s1081_s16, %s1081_s16 }
  0x1d   :  { %p1088_p0 = por %p1087_p13, %p1086_p12 }
  0x1f   :  { %p1089_p1 = pnand %p1088_p0, %p1082_p11 }
  0x21   :  { %1092 = shalt.err (!%p1089_p1)
}
  0x22   :  { %s1147_s1 = smov 64   ;;  %s1148_s17 = smov 4  }
  0x23   :  { %24 = dma.hbm_to_vmem [thread:$0]  %s1280_s0, 128, %s19_s8, [#allocation4], %s1147_s1, %s1147_s1, %s1148_s17  }
  0x24   :  { %s1149_s20 = smov [#allocation8]   ;;  %s1093_s24 = scalar_lea.hbm %s1283_s3, 4096 }
  0x25   :  { %s44_s21 = sshll.u32 %s1149_s20, 4  ;;  %p1094_p2 = scmp.ne.s32.totalorder %s1283_s3, %s1093_s24  ;;  %s45_s21 = int_to_ptr.vmem [resolvable:$true] %s44_s21 }
  0x26   :  { %p1097_p3 = scmp.lt.u32.totalorder %s1093_s24, %s1283_s3 }
  0x28   :  { %p1099_p4 = pnand %p1097_p3, %p1094_p2 }
  0x2a   :  { %1102 = shalt.err (!%p1099_p4)
}
  0x2b   :  { %s1103_s29 = scalar_lea.vmem %s45_s21, 4096  ;;  %p1108_p6 = scmp.lt.s32.totalorder %s45_s21, %s45_s21 }
  0x2c   :  { %p1104_p5 = scmp.ne.s32.totalorder %s45_s21, %s1103_s29  ;;  %p1109_p7 = scmp.lt.s32.totalorder %s1103_s29, %s1103_s29 }
  0x2e   :  { %p1110_p8 = por %p1109_p7, %p1108_p6 }
  0x30   :  { %p1111_p9 = pnand %p1110_p8, %p1104_p5 }
  0x32   :  { %1114 = shalt.err (!%p1111_p9)
}
  0x33   :  { %50 = dma.hbm_to_vmem [thread:$0]  %s1283_s3, 4096, %s45_s21, [#allocation7], %s1147_s1, %s1147_s1, %s1148_s17  }
  0x34   :  { %1137 = dma.done.wait [#allocation4], 128  }
  0x35   :  { %1138 = vsyncadd [#allocation4], 4294967168 }
  0x36   :  { %1139 = dma.done.wait [#allocation7], 8192  }
  0x37   :  { %1140 = vsyncadd [#allocation7], 4294959104  ;;  %v1150_v0 = vmov 0   ;;  %v952_v1 = vld [vmem:[#allocation6 + $0x4] ss:$16 sps:$4 sm:$0xff]   ;;  %v1000_v33 = vld [vmem:[#allocation3] sm:$0xff]  }
  0x38   :  { %323 = vmatprep.mubr.bf16.mxu0 %v1150_v0  ;;  %366 = vmatprep.mubr.bf16.mxu1 %v1150_v0  ;;  %v954_v2 = vld [vmem:[#allocation6 + $0xc] ss:$16 sps:$4 sm:$0xff]   ;;  %v956_v3 = vld [vmem:[#allocation6] ss:$16 sps:$4 sm:$0xff]   ;;  %v957_v4 = vld [vmem:[#allocation6 + $0x8] ss:$16 sps:$4 sm:$0xff]  }
  0x39   :  { %291 = vmatprep.subr.bf16.mxu0 %v952_v1  ;;  %334 = vmatprep.subr.bf16.mxu1 %v954_v2  ;;  %v958_v5 = vld [vmem:[#allocation6 + $0x24] ss:$16 sps:$4 sm:$0xff]   ;;  %v960_v6 = vld [vmem:[#allocation6 + $0x2c] ss:$16 sps:$4 sm:$0xff]   ;;  %v962_v7 = vld [vmem:[#allocation6 + $0x20] ss:$16 sps:$4 sm:$0xff]   ;;  %v105_v2 = vlaneseq }
  0x3a   :  { %292 = vmatpush1.bf16.msra.mxu0 %v956_v3  ;;  %335 = vmatpush1.bf16.msra.mxu1 %v957_v4  ;;  %v963_v8 = vld [vmem:[#allocation6 + $0x28] ss:$16 sps:$4 sm:$0xff]   ;;  %v964_v9 = vld [vmem:[#allocation6 + $0x44] ss:$16 sps:$4 sm:$0xff]   ;;  %v966_v10 = vld [vmem:[#allocation6 + $0x4c] ss:$16 sps:$4 sm:$0xff]  }
  0x3b   :  { %293 = vmatprep.subr.bf16.mxu0 %v958_v5  ;;  %336 = vmatprep.subr.bf16.mxu1 %v960_v6  ;;  %v968_v11 = vld [vmem:[#allocation6 + $0x40] ss:$16 sps:$4 sm:$0xff]   ;;  %v969_v12 = vld [vmem:[#allocation6 + $0x48] ss:$16 sps:$4 sm:$0xff]   ;;  %v970_v13 = vld [vmem:[#allocation6 + $0x64] ss:$16 sps:$4 sm:$0xff]  }
  0x3c   :  { %v972_v14 = vld [vmem:[#allocation6 + $0x6c] ss:$16 sps:$4 sm:$0xff]   ;;  %v974_v15 = vld [vmem:[#allocation6 + $0x60] ss:$16 sps:$4 sm:$0xff]   ;;  %v975_v16 = vld [vmem:[#allocation6 + $0x68] ss:$16 sps:$4 sm:$0xff]  }
  0x3d   :  { %v976_v17 = vld [vmem:[#allocation6 + $0x84] ss:$16 sps:$4 sm:$0xff]   ;;  %v978_v18 = vld [vmem:[#allocation6 + $0x8c] ss:$16 sps:$4 sm:$0xff]   ;;  %v980_v19 = vld [vmem:[#allocation6 + $0x80] ss:$16 sps:$4 sm:$0xff]  }
  0x3e   :  { %294 = vmatpush1.bf16.msra.mxu0 %v962_v7  ;;  %337 = vmatpush1.bf16.msra.mxu1 %v963_v8  ;;  %v981_v20 = vld [vmem:[#allocation6 + $0x88] ss:$16 sps:$4 sm:$0xff]   ;;  %v982_v21 = vld [vmem:[#allocation6 + $0xa4] ss:$16 sps:$4 sm:$0xff]   ;;  %v984_v22 = vld [vmem:[#allocation6 + $0xac] ss:$16 sps:$4 sm:$0xff]  }
  0x3f   :  { %295 = vmatprep.subr.bf16.mxu0 %v964_v9  ;;  %338 = vmatprep.subr.bf16.mxu1 %v966_v10  ;;  %v986_v23 = vld [vmem:[#allocation6 + $0xa0] ss:$16 sps:$4 sm:$0xff]   ;;  %v987_v24 = vld [vmem:[#allocation6 + $0xa8] ss:$16 sps:$4 sm:$0xff]   ;;  %v988_v25 = vld [vmem:[#allocation6 + $0xc4] ss:$16 sps:$4 sm:$0xff]  }
  0x40   :  { %v990_v26 = vld [vmem:[#allocation6 + $0xcc] ss:$16 sps:$4 sm:$0xff]   ;;  %v992_v27 = vld [vmem:[#allocation6 + $0xc0] ss:$16 sps:$4 sm:$0xff]   ;;  %v993_v28 = vld [vmem:[#allocation6 + $0xc8] ss:$16 sps:$4 sm:$0xff]  }
  0x41   :  { %v994_v29 = vld [vmem:[#allocation6 + $0xe4] ss:$16 sps:$4 sm:$0xff]   ;;  %v996_v30 = vld [vmem:[#allocation6 + $0xec] ss:$16 sps:$4 sm:$0xff]   ;;  %v998_v31 = vld [vmem:[#allocation6 + $0xe0] ss:$16 sps:$4 sm:$0xff]  }
  0x42   :  { %296 = vmatpush1.bf16.msra.mxu0 %v968_v11  ;;  %339 = vmatpush1.bf16.msra.mxu1 %v969_v12  ;;  %v999_v32 = vld [vmem:[#allocation6 + $0xe8] ss:$16 sps:$4 sm:$0xff]   ;;  %v1001_v34 = vld [vmem:[#allocation8 + $0x40] sm:$0xff]   ;;  %v1009_v42 = vld [vmem:[#allocation8 + $0x50] sm:$0xff]   ;;  %v106_v3 = vshrl.u32 %v105_v2, 7  ;;  %s1151_s8 = smov [#allocation9]  }
  0x43   :  { %297 = vmatprep.subr.bf16.mxu0 %v970_v13  ;;  %340 = vmatprep.subr.bf16.mxu1 %v972_v14  ;;  %v1002_v35 = vld [vmem:[#allocation8 + $0xc0] sm:$0xff]   ;;  %v1005_v38 = vld [vmem:[#allocation8 + $0x48] sm:$0xff]   ;;  %v1010_v43 = vld [vmem:[#allocation8 + $0xd0] sm:$0xff]   ;;  %s818_s9 = sshll.u32 %s1151_s8, 4  ;;  %s819_s9 = int_to_ptr.vmem [resolvable:$true] %s818_s9 }
  0x44   :  { %v1003_v36 = vld [vmem:[#allocation8] sm:$0xff]   ;;  %v1006_v39 = vld [vmem:[#allocation8 + $0xc8] sm:$0xff]   ;;  %v1011_v44 = vld [vmem:[#allocation8 + $0x10] sm:$0xff]   ;;  %v107_v4 = vsub.s32 0, %v106_v3  ;;  %v115_v5 = vsub.s32 2, %v106_v3  ;;  %v111_v7 = vsub.s32 1, %v106_v3  ;;  %p1120_p11 = scmp.lt.s32.totalorder %s819_s9, %s819_s9 }
  0x45   :  { %v1004_v37 = vld [vmem:[#allocation8 + $0x80] sm:$0xff]   ;;  %v1007_v40 = vld [vmem:[#allocation8 + $0x8] sm:$0xff]   ;;  %v1012_v45 = vld [vmem:[#allocation8 + $0x90] sm:$0xff]   ;;  %v119_v8 = vsub.s32 3, %v106_v3  ;;  %s1115_s10 = scalar_lea.vmem %s819_s9, 256 }
  0x46   :  { %298 = vmatpush1.bf16.msra.mxu0 %v974_v15  ;;  %341 = vmatpush1.bf16.msra.mxu1 %v975_v16  ;;  %v1008_v41 = vld [vmem:[#allocation8 + $0x88] sm:$0xff]   ;;  %v1013_v46 = vld [vmem:[#allocation8 + $0x58] sm:$0xff]   ;;  %v1017_v50 = vld [vmem:[#allocation8 + $0x60] sm:$0xff]   ;;  %p1116_p10 = scmp.ne.s32.totalorder %s819_s9, %s1115_s10  ;;  %p1121_p12 = scmp.lt.s32.totalorder %s1115_s10, %s1115_s10 }
  0x47   :  { %299 = vmatprep.subr.bf16.mxu0 %v976_v17  ;;  %342 = vmatprep.subr.bf16.mxu1 %v978_v18  ;;  %v1014_v47 = vld [vmem:[#allocation8 + $0xd8] sm:$0xff]   ;;  %v1018_v51 = vld [vmem:[#allocation8 + $0xe0] sm:$0xff]   ;;  %v1021_v54 = vld [vmem:[#allocation8 + $0x68] sm:$0xff]  }
  0x48   :  { %v1015_v48 = vld [vmem:[#allocation8 + $0x18] sm:$0xff]   ;;  %v1019_v52 = vld [vmem:[#allocation8 + $0x20] sm:$0xff]   ;;  %v1022_v55 = vld [vmem:[#allocation8 + $0xe8] sm:$0xff]   ;;  %p1122_p13 = por %p1121_p12, %p1120_p11 }
  0x49   :  { %v1016_v49 = vld [vmem:[#allocation8 + $0x98] sm:$0xff]   ;;  %v1020_v53 = vld [vmem:[#allocation8 + $0xa0] sm:$0xff]   ;;  %v1023_v56 = vld [vmem:[#allocation8 + $0x28] sm:$0xff]  }
  0x4a   :  { %300 = vmatpush1.bf16.msra.mxu0 %v980_v19  ;;  %343 = vmatpush1.bf16.msra.mxu1 %v981_v20  ;;  %v1024_v57 = vld [vmem:[#allocation8 + $0xa8] sm:$0xff]   ;;  %v1025_v58 = vld [vmem:[#allocation8 + $0x70] sm:$0xff]   ;;  %v1029_v62 = vld [vmem:[#allocation8 + $0x78] sm:$0xff]   ;;  %p1123_p0 = pnand %p1122_p13, %p1116_p10 }
  0x4b   :  { %301 = vmatprep.subr.bf16.mxu0 %v982_v21  ;;  %344 = vmatprep.subr.bf16.mxu1 %v984_v22  ;;  %v1026_v59 = vld [vmem:[#allocation8 + $0xf0] sm:$0xff]   ;;  %v1030_v63 = vld [vmem:[#allocation8 + $0xf8] sm:$0xff]  }
  0x4c   :  { %v1027_v60 = vld [vmem:[#allocation8 + $0x30] sm:$0xff]   ;;  %v1031_v0 = vld [vmem:[#allocation8 + $0x38] sm:$0xff]  }
  0x4d   :  { %v1028_v61 = vld [vmem:[#allocation8 + $0xb0] sm:$0xff]   ;;  %v1032_v1 = vld [vmem:[#allocation8 + $0xb8] sm:$0xff]  }
  0x4e   :  { %302 = vmatpush1.bf16.msra.mxu0 %v986_v23  ;;  %345 = vmatpush1.bf16.msra.mxu1 %v987_v24  ;;  %v103_v6 = vld [vmem:[%s1282_s2] sm:$0xf] }
  0x4f   :  { %303 = vmatprep.subr.bf16.mxu0 %v988_v25  ;;  %346 = vmatprep.subr.bf16.mxu1 %v990_v26  ;;  %v108_v9 = vrot.slane %v103_v6, %v107_v4  ;;  %v116_v10 = vrot.slane %v103_v6, %v115_v5  ;;  %v112_v11 = vrot.slane %v103_v6, %v111_v7 }
  0x50   :  { %v120_v12 = vrot.slane %v103_v6, %v119_v8 }
  0x52   :  { %304 = vmatpush1.bf16.msra.mxu0 %v992_v27  ;;  %347 = vmatpush1.bf16.msra.mxu1 %v993_v28 }
  0x53   :  { %305 = vmatprep.subr.bf16.mxu0 %v994_v29  ;;  %348 = vmatprep.subr.bf16.mxu1 %v996_v30 }
  0x56   :  { %306 = vmatpush1.bf16.msra.mxu0 %v998_v31  ;;  %349 = vmatpush1.bf16.msra.mxu1 %v999_v32 }
  0x57   :  { %897 = vmatprep.subr.bf16.mxu0 %v1001_v34  ;;  %919 = vmatprep.subr.bf16.mxu1 %v1002_v35 }
  0x59   :  { %324 = vmatmul.mubr.bf16.vlgmr.msra.gmra.mrb[0].mxu0 %v1000_v33  ;;  %367 = vmatmul.mubr.bf16.vlgmr.msra.gmra.mrb[0].mxu1 %v1000_v33 }
  0x5a   :  { %898 = vmatpush3.bf16.msra.mxu0 %v1003_v36  ;;  %920 = vmatpush3.bf16.msra.mxu1 %v1004_v37 }
  0x5b   :  { %899 = vmatprep.subr.bf16.mxu0 %v1005_v38  ;;  %921 = vmatprep.subr.bf16.mxu1 %v1006_v39 }
  0x5e   :  { %900 = vmatpush3.bf16.msra.mxu0 %v1007_v40  ;;  %922 = vmatpush3.bf16.msra.mxu1 %v1008_v41 }
  0x5f   :  { %901 = vmatprep.subr.bf16.mxu0 %v1009_v42  ;;  %923 = vmatprep.subr.bf16.mxu1 %v1010_v43 }
  0x62   :  { %902 = vmatpush3.bf16.msra.mxu0 %v1011_v44  ;;  %924 = vmatpush3.bf16.msra.mxu1 %v1012_v45 }
  0x63   :  { %903 = vmatprep.subr.bf16.mxu0 %v1013_v46  ;;  %925 = vmatprep.subr.bf16.mxu1 %v1014_v47 }
  0x66   :  { %904 = vmatpush3.bf16.msra.mxu0 %v1015_v48  ;;  %926 = vmatpush3.bf16.msra.mxu1 %v1016_v49 }
  0x67   :  { %905 = vmatprep.subr.bf16.mxu0 %v1017_v50  ;;  %927 = vmatprep.subr.bf16.mxu1 %v1018_v51 }
  0x6a   :  { %906 = vmatpush3.bf16.msra.mxu0 %v1019_v52  ;;  %928 = vmatpush3.bf16.msra.mxu1 %v1020_v53 }
  0x6b   :  { %907 = vmatprep.subr.bf16.mxu0 %v1021_v54  ;;  %929 = vmatprep.subr.bf16.mxu1 %v1022_v55 }
  0x6e   :  { %908 = vmatpush3.bf16.msra.mxu0 %v1023_v56  ;;  %930 = vmatpush3.bf16.msra.mxu1 %v1024_v57 }
  0x6f   :  { %909 = vmatprep.subr.bf16.mxu0 %v1025_v58  ;;  %931 = vmatprep.subr.bf16.mxu1 %v1026_v59 }
  0x72   :  { %910 = vmatpush3.bf16.msra.mxu0 %v1027_v60  ;;  %932 = vmatpush3.bf16.msra.mxu1 %v1028_v61 }
  0x73   :  { %911 = vmatprep.subr.bf16.mxu0 %v1029_v62  ;;  %933 = vmatprep.subr.bf16.mxu1 %v1030_v63 }
  0x76   :  { %912 = vmatpush3.bf16.msra.mxu0 %v1031_v0  ;;  %934 = vmatpush3.bf16.msra.mxu1 %v1032_v1 }
 0x12c   :  { %v325_v13 = vpop.f32.mrb[0].mxu0  ;;  %v368_v14 = vpop.f32.mrb[0].mxu1 }
 0x12d   :  { %v1223_v15 = vadd.f32 %v325_v13, %v108_v9  ;;  %v1225_v16 = vadd.f32 %v368_v14, %v116_v10  ;;  %v327_v17 = vpop.f32.mrb[1].mxu0  ;;  %v370_v18 = vpop.f32.mrb[1].mxu1 }
 0x12e   :  { %v1227_v19 = vadd.f32 %v327_v17, %v112_v11  ;;  %v1229_v20 = vadd.f32 %v370_v18, %v120_v12  ;;  %v329_v21 = vpop.f32.mrb[2].mxu0  ;;  %v372_v22 = vpop.f32.mrb[2].mxu1 }
 0x12f   :  { %v385_v23 = vmul.f32 0.044715, %v1223_v15  ;;  %v387_v24 = vmul.f32 0.044715, %v1225_v16  ;;  %v330_v25 = vadd.f32 %v329_v21, %v108_v9  ;;  %v373_v26 = vadd.f32 %v372_v22, %v116_v10  ;;  %v331_v27 = vpop.f32.mrb[3].mxu0  ;;  %v374_v28 = vpop.f32.mrb[3].mxu1 }
 0x130   :  { %v386_v29 = vmul.f32 0.044715, %v1227_v19  ;;  %v388_v30 = vmul.f32 0.044715, %v1229_v20  ;;  %v1235_v31 = vadd.f32 %v331_v27, %v112_v11  ;;  %v1237_v32 = vadd.f32 %v374_v28, %v120_v12 }
 0x131   :  { %v393_v33 = vmul.f32 %v385_v23, %v1223_v15  ;;  %v395_v34 = vmul.f32 %v387_v24, %v1225_v16  ;;  %v389_v35 = vmul.f32 0.044715, %v330_v25  ;;  %v391_v36 = vmul.f32 0.044715, %v373_v26 }
 0x132   :  { %v394_v37 = vmul.f32 %v386_v29, %v1227_v19  ;;  %v396_v38 = vmul.f32 %v388_v30, %v1229_v20  ;;  %v390_v39 = vmul.f32 0.044715, %v1235_v31  ;;  %v392_v40 = vmul.f32 0.044715, %v1237_v32 }
 0x133   :  { %v401_v41 = vmul.f32 %v393_v33, %v1223_v15  ;;  %v403_v42 = vmul.f32 %v395_v34, %v1225_v16  ;;  %v397_v43 = vmul.f32 %v389_v35, %v330_v25  ;;  %v399_v44 = vmul.f32 %v391_v36, %v373_v26 }
 0x134   :  { %v402_v45 = vmul.f32 %v394_v37, %v1227_v19  ;;  %v404_v46 = vmul.f32 %v396_v38, %v1229_v20  ;;  %v398_v47 = vmul.f32 %v390_v39, %v1235_v31  ;;  %v400_v48 = vmul.f32 %v392_v40, %v1237_v32 }
 0x135   :  { %v409_v49 = vadd.f32 %v401_v41, %v1223_v15  ;;  %v411_v50 = vadd.f32 %v403_v42, %v1225_v16  ;;  %v405_v51 = vmul.f32 %v397_v43, %v330_v25  ;;  %v407_v52 = vmul.f32 %v399_v44, %v373_v26 }
 0x136   :  { %v406_v53 = vmul.f32 %v398_v47, %v1235_v31  ;;  %v408_v54 = vmul.f32 %v400_v48, %v1237_v32  ;;  %v410_v59 = vadd.f32 %v402_v45, %v1227_v19  ;;  %v412_v63 = vadd.f32 %v404_v46, %v1229_v20 }
 0x137   :  { %v417_v55 = vmul.f32 0.7978846, %v409_v49  ;;  %v419_v56 = vmul.f32 0.7978846, %v411_v50  ;;  %v413_v57 = vadd.f32 %v405_v51, %v330_v25  ;;  %v415_v58 = vadd.f32 %v407_v52, %v373_v26  ;;  %v896_v51 = vld [vmem:[%s1284_s4] ss:$0 sm:$0xff] }
 0x138   :  { %v414_v60 = vadd.f32 %v406_v53, %v1235_v31  ;;  %v418_v0 = vmul.f32 0.7978846, %v410_v59  ;;  %v416_v2 = vadd.f32 %v408_v54, %v1237_v32  ;;  %v420_v3 = vmul.f32 0.7978846, %v412_v63 }
 0x139   :  { %1033 = vtanh.f32 %v417_v55  ;;  %v421_v61 = vmul.f32 0.7978846, %v413_v57  ;;  %v423_v62 = vmul.f32 0.7978846, %v415_v58  ;;  %v377_v11 = vmul.f32 0.5, %v1223_v15 }
 0x13a   :  { %1035 = vtanh.f32 %v419_v56  ;;  %v422_v1 = vmul.f32 0.7978846, %v414_v60  ;;  %v424_v4 = vmul.f32 0.7978846, %v416_v2  ;;  %v381_v12 = vmul.f32 0.5, %v330_v25 }
 0x13b   :  { %1037 = vtanh.f32 %v421_v61  ;;  %v379_v17 = vmul.f32 0.5, %v1225_v16  ;;  %v383_v18 = vmul.f32 0.5, %v373_v26  ;;  %v378_v23 = vmul.f32 0.5, %v1227_v19 }
 0x13c   :  { %1039 = vtanh.f32 %v423_v62  ;;  %v382_v30 = vmul.f32 0.5, %v1235_v31  ;;  %v380_v25 = vmul.f32 0.5, %v1229_v20  ;;  %v384_v36 = vmul.f32 0.5, %v1237_v32 }
 0x13d   :  { %1041 = vtanh.f32 %v418_v0 }
 0x13e   :  { %1043 = vtanh.f32 %v422_v1 }
 0x13f   :  { %1045 = vtanh.f32 %v420_v3 }
 0x140   :  { %1047 = vtanh.f32 %v424_v4 }
 0x143   :  { %v1034_v5 = vpop.eup %1033 }
 0x144   :  { %v1036_v6 = vpop.eup %1035  ;;  %v433_v7 = vadd.f32 1.0, %v1034_v5 }
 0x145   :  { %v1038_v8 = vpop.eup %1037  ;;  %v435_v9 = vadd.f32 1.0, %v1036_v6 }
 0x146   :  { %v1040_v10 = vpop.eup %1039  ;;  %v437_v13 = vadd.f32 1.0, %v1038_v8  ;;  %v441_v27 = vmul.f32 %v433_v7, %v377_v11 }
 0x147   :  { %v1042_v14 = vpop.eup %1041  ;;  %v439_v21 = vadd.f32 1.0, %v1040_v10  ;;  %v443_v34 = vmul.f32 %v435_v9, %v379_v17 }
 0x148   :  { %v1044_v22 = vpop.eup %1043  ;;  %v434_v24 = vadd.f32 1.0, %v1042_v14  ;;  %v445_v28 = vmul.f32 %v437_v13, %v381_v12 }
 0x149   :  { %v1046_v29 = vpop.eup %1045  ;;  %v438_v33 = vadd.f32 1.0, %v1044_v22  ;;  %v447_v35 = vmul.f32 %v439_v21, %v383_v18 }
 0x14a   :  { %v1048_v15 = vpop.eup %1047  ;;  %v436_v16 = vadd.f32 1.0, %v1046_v29  ;;  %v451_v26 = vpack.c.bf16 %v445_v28, %v441_v27  ;;  %v442_v37 = vmul.f32 %v434_v24, %v378_v23 }
 0x14b   :  { %v446_v38 = vmul.f32 %v438_v33, %v382_v30  ;;  %v440_v39 = vadd.f32 1.0, %v1048_v15  ;;  %v453_v19 = vpack.c.bf16 %v447_v35, %v443_v34 }
 0x14c   :  { %v444_v41 = vmul.f32 %v436_v16, %v380_v25 }
 0x14d   :  { %v452_v40 = vpack.c.bf16 %v446_v38, %v442_v37  ;;  %v448_v42 = vmul.f32 %v440_v39, %v384_v36 }
 0x14f   :  { %743 = vmatprep.mubr.bf16.mxu0 %v452_v40  ;;  %v454_v43 = vpack.c.bf16 %v448_v42, %v444_v41 }
 0x150   :  { %744 = vmatmul.mubr.bf16.vlgmr.msra.gmra.mrb[4].mxu0 %v451_v26 }
 0x151   :  { %784 = vmatprep.mubr.bf16.mxu1 %v454_v43 }
 0x152   :  { %785 = vmatmul.mubr.bf16.vlgmr.msra.gmra.mrb[4].mxu1 %v453_v19 }
 0x223   :  { %v913_v31 = vpop.f32.mrb[4].mxu0 }
 0x224   :  { %v914_v44 = vpop.f32.mrb[5].mxu0 }
 0x225   :  { %v935_v45 = vpop.f32.mrb[4].mxu1  ;;  %v915_v20 = vadd.f32 %v914_v44, %v913_v31  ;;  %v916_v46 = vpop.f32.mrb[6].mxu0 }
 0x226   :  { %v936_v32 = vpop.f32.mrb[5].mxu1  ;;  %v917_v47 = vpop.f32.mrb[7].mxu0 }
 0x227   :  { %v937_v48 = vadd.f32 %v936_v32, %v935_v45  ;;  %v938_v49 = vpop.f32.mrb[6].mxu1  ;;  %v918_v50 = vadd.f32 %v917_v47, %v916_v46 }
 0x228   :  { %v939_v52 = vpop.f32.mrb[7].mxu1 }
 0x229   :  { %v787_v53 = vadd.f32 %v937_v48, %v915_v20  ;;  %v940_v54 = vadd.f32 %v939_v52, %v938_v49 }
 0x22b   :  { %v809_v55 = vadd.f32 %v896_v51, %v787_v53  ;;  %v790_v56 = vadd.f32 %v940_v54, %v918_v50 }
 0x22d   :  { %811 = vst [vmem:[#allocation9] sm:$0xff] %v809_v55  ;;  %v810_v57 = vadd.f32 %v896_v51, %v790_v56 }
 0x22f   :  { %812 = vst [vmem:[#allocation9 + $0x8] sm:$0xff] %v810_v57 }
 0x230   :  { %1126 = shalt.err (!%p1123_p0)
}
 0x231   :  { %s1127_s12 = scalar_lea.hbm %s1285_s5, 256 }
 0x232   :  { %p1128_p1 = scmp.ne.s32.totalorder %s1285_s5, %s1127_s12  ;;  %p1131_p2 = scmp.lt.u32.totalorder %s1127_s12, %s1285_s5 }
 0x234   :  { %p1133_p3 = pnand %p1131_p2, %p1128_p1 }
 0x236   :  { %1136 = shalt.err (!%p1133_p3)
}
 0x237   :  { %s1152_s1 = smov 128   ;;  %s1153_s17 = smov 8  }
 0x238   :  { %824 = dma.vmem_to_hbm [thread:$0]  %s819_s9, 256, %s1285_s5, [#allocation5], %s1152_s1, %s1152_s1, %s1153_s17  }
 0x239   :  { %1141 = dma.done.wait [#allocation5], 256  }
 0x23a   :  { %1142 = vsyncadd [#allocation5], 4294967040 }
 0x23b   :  { %828 = vsyncpa [#allocation4], 1 }
 0x23c   :  { %829 = vsyncpa [#allocation7], 1 }
 0x23d   :  { %830 = vsyncpa [#allocation5], 1 }

</bundles_post_ra>
